<compile_context>
chip_gen: v5e
topology: v5e:2x2
jax: 0.10.0
libtpu: 0.0.40
codegen_flags: <defaults>
</compile_context>

<pallas_src>
import jax
import jax.numpy as jnp
from jax.experimental import pallas as pl
from jax.experimental.pallas import tpu as pltpu

HIDDEN = 256
STATE_DIM = 16
ACTION_DIM = 2
IN_DIM = STATE_DIM + ACTION_DIM          # 18
IN_PAD = 32                              # padded combined-feature dim (sublane multiple)
MAX_B_BLK = 256                          # batch tile for large batches


def _tensorcores_per_chip() -> int:
    """2 TensorCores per chip on v7x; 1 on v5e / v6e."""
    try:
        kind = jax.devices()[0].device_kind.lower()
    except Exception:
        return 1
    return 2 if "v7" in kind else 1


_SPLIT_TOWERS = _tensorcores_per_chip() >= 2


# --------------------------------------------------------------------------
# Kernels
# --------------------------------------------------------------------------
def _ddqn_kernel_merged(x_ref, w1_ref, b1_ref, w2_ref, b2_ref, w3_ref, b3_ref, q_ref):
    """Single-TensorCore path: both towers in one body; grid = (batch blocks,)."""
    x = x_ref[...]                                                    # (b_blk, IN_PAD) bf16
    for t in range(2):                                                # static unroll
        h = jnp.dot(x, w1_ref[t], preferred_element_type=jnp.float32) + b1_ref[t]
        h = jnp.maximum(h, 0.0).astype(jnp.bfloat16)
        h = jnp.dot(h, w2_ref[t], preferred_element_type=jnp.float32) + b2_ref[t]
        h = jnp.maximum(h, 0.0)                                       # f32 (b_blk, H)
        # Layer 3: f32 broadcast-multiply + f32 lane reduction -> batch on lanes.
        q = jnp.sum(h * w3_ref[t], axis=-1) + b3_ref[t]               # (b_blk,) f32
        q_ref[t] = q[None, :]                                         # lane-dense store


def _ddqn_kernel_split(x_ref, w1_ref, b1_ref, w2_ref, b2_ref, w3_ref, b3_ref, q_ref):
    """v7x path: one tower per grid step; tower axis shards across TensorCores."""
    x = x_ref[...]                                                    # (b_blk, IN_PAD) bf16
    h = jnp.dot(x, w1_ref[0], preferred_element_type=jnp.float32) + b1_ref[0]
    h = jnp.maximum(h, 0.0).astype(jnp.bfloat16)
    h = jnp.dot(h, w2_ref[0], preferred_element_type=jnp.float32) + b2_ref[0]
    h = jnp.maximum(h, 0.0)                                           # f32
    q = jnp.sum(h * w3_ref[0], axis=-1) + b3_ref[pl.program_id(0)]    # (b_blk,) f32
    q_ref[0] = q[None, :]                                             # lane-dense store


# --------------------------------------------------------------------------
# Batch blocking + pallas_call wrapper
# --------------------------------------------------------------------------
def _batch_blocking(B):
    """Return (padded_batch, batch_block, num_batch_blocks)."""
    if B <= MAX_B_BLK:
        b_pad = max(16, ((B + 15) // 16) * 16)      # bf16 sublane tile = 16
        return b_pad, b_pad, 1
    b_pad = ((B + MAX_B_BLK - 1) // MAX_B_BLK) * MAX_B_BLK
    return b_pad, MAX_B_BLK, b_pad // MAX_B_BLK


def _pallas_forward(x_pad, padded_params, b_blk, nb):
    b_pad = x_pad.shape[0]
    w1, b1, w2, b2, w3, b3 = padded_params

    out_shape = jax.ShapeDtypeStruct((2, 1, b_pad), jnp.float32)
    smem_spec = pl.BlockSpec(memory_space=pltpu.MemorySpace.SMEM)     # b3 scalars

    if _SPLIT_TOWERS:
        # v7x: tower axis outermost & parallel -> one tower per TensorCore;
        # each core DMAs only its own tower's weights, resident across batch blocks.
        grid = (2, nb)
        in_specs = [
            pl.BlockSpec((b_blk, IN_PAD),      lambda t, b: (b, 0)),     # x (shared)
            pl.BlockSpec((1, IN_PAD, HIDDEN),  lambda t, b: (t, 0, 0)),  # w1
            pl.BlockSpec((1, 1, HIDDEN),       lambda t, b: (t, 0, 0)),  # b1
            pl.BlockSpec((1, HIDDEN, HIDDEN),  lambda t, b: (t, 0, 0)),  # w2
            pl.BlockSpec((1, 1, HIDDEN),       lambda t, b: (t, 0, 0)),  # b2
            pl.BlockSpec((1, 1, HIDDEN),       lambda t, b: (t, 0, 0)),  # w3 (row)
            smem_spec,                                                   # b3
        ]
        out_specs = pl.BlockSpec((1, 1, b_blk), lambda t, b: (t, 0, b))
        kernel = _ddqn_kernel_split
        dims = ("parallel", "parallel")
    else:
        # v5e / v6e (single TensorCore): both towers in one body, grid over
        # batch blocks only -> half the grid steps and x DMAs.
        grid = (nb,)
        in_specs = [
            pl.BlockSpec((b_blk, IN_PAD),      lambda b: (b, 0)),        # x
            pl.BlockSpec((2, IN_PAD, HIDDEN),  lambda b: (0, 0, 0)),     # w1 (both towers)
            pl.BlockSpec((2, 1, HIDDEN),       lambda b: (0, 0, 0)),     # b1
            pl.BlockSpec((2, HIDDEN, HIDDEN),  lambda b: (0, 0, 0)),     # w2
            pl.BlockSpec((2, 1, HIDDEN),       lambda b: (0, 0, 0)),     # b2
            pl.BlockSpec((2, 1, HIDDEN),       lambda b: (0, 0, 0)),     # w3 (rows)
            smem_spec,                                                   # b3
        ]
        out_specs = pl.BlockSpec((2, 1, b_blk), lambda b: (0, 0, b))
        kernel = _ddqn_kernel_merged
        dims = ("parallel",)

    return pl.pallas_call(
        kernel,
        out_shape=out_shape,
        grid=grid,
        in_specs=in_specs,
        out_specs=out_specs,
        compiler_params=pltpu.CompilerParams(
            dimension_semantics=dims,
            vmem_limit_bytes=16 << 20,
        ),
    )(x_pad, w1, b1, w2, b2, w3, b3)


# --------------------------------------------------------------------------
# Parameter handling
# --------------------------------------------------------------------------
def init_params(key):
    """Deterministic init matching torch nn.Linear shapes (stored as (in, out))."""
    def linear(key, fan_in, fan_out):
        kw, kb = jax.random.split(key)
        bound = 1.0 / jnp.sqrt(fan_in)
        w = jax.random.uniform(kw, (fan_in, fan_out), jnp.float32, -bound, bound)
        b = jax.random.uniform(kb, (1, fan_out), jnp.float32, -bound, bound)
        return w, b

    keys = jax.random.split(key, 6)
    w1a, b1a = linear(keys[0], IN_DIM, HIDDEN)
    w2a, b2a = linear(keys[1], HIDDEN, HIDDEN)
    w3a, b3a = linear(keys[2], HIDDEN, 1)
    w1b, b1b = linear(keys[3], IN_DIM, HIDDEN)
    w2b, b2b = linear(keys[4], HIDDEN, HIDDEN)
    w3b, b3b = linear(keys[5], HIDDEN, 1)
    return (w1a, b1a, w2a, b2a, w3a, b3a, w1b, b1b, w2b, b2b, w3b, b3b)


def prepare_params(params):
    """Pad + stack the two towers + cast MXU weights to bf16.  Call ONCE at init."""
    (w1a, b1a, w2a, b2a, w3a, b3a, w1b, b1b, w2b, b2b, w3b, b3b) = params

    def pad_w1(w):   # (IN_DIM, H) -> (IN_PAD, H); zero rows for the padded features
        return jnp.pad(w, ((0, IN_PAD - IN_DIM), (0, 0)))

    w1 = jnp.stack([pad_w1(w1a), pad_w1(w1b)]).astype(jnp.bfloat16)   # (2, IN_PAD, H)
    b1 = jnp.stack([b1a, b1b]).astype(jnp.float32)                    # (2, 1, H)
    w2 = jnp.stack([w2a, w2b]).astype(jnp.bfloat16)                   # (2, H, H)
    b2 = jnp.stack([b2a, b2b]).astype(jnp.float32)                    # (2, 1, H)
    # Final layer stays f32 (elementwise multiply + f32 lane reduction in-kernel).
    w3 = jnp.stack([w3a.T, w3b.T]).astype(jnp.float32)                # (2, 1, H)
    b3 = jnp.concatenate([b3a.reshape(-1), b3b.reshape(-1)]).astype(jnp.float32)  # (2,)
    return (w1, b1, w2, b2, w3, b3)


# --------------------------------------------------------------------------
# Forward wrapper (matches the PyTorch module: returns (Q1, Q2), each (B, 1))
# --------------------------------------------------------------------------
def double_deep_q_net(state, action, padded_params):
    B = state.shape[0]
    b_pad, b_blk, nb = _batch_blocking(B)
    combined = jnp.concatenate([state, action], axis=1).astype(jnp.bfloat16)   # (B, 18)
    x_pad = jnp.pad(combined, ((0, b_pad - B), (0, IN_PAD - IN_DIM)))          # (b_pad, 32)
    q = _pallas_forward(x_pad, padded_params, b_blk, nb)    # (2, 1, b_pad) f32
    return q[0, 0, :B][:, None], q[1, 0, :B][:, None]


# --------------------------------------------------------------------------
# Reference (same mixed bf16-matmul / f32-accumulate / f32-final-layer scheme)
# --------------------------------------------------------------------------
def _reference_forward(state, action, params):
    (w1a, b1a, w2a, b2a, w3a, b3a, w1b, b1b, w2b, b2b, w3b, b3b) = params
    x = jnp.concatenate([state, action], axis=1).astype(jnp.bfloat16)

    def tower(x, w1, b1, w2, b2, w3, b3):
        h = jnp.dot(x, w1.astype(jnp.bfloat16),
                    preferred_element_type=jnp.float32) + b1
        h = jnp.maximum(h, 0.0).astype(jnp.bfloat16)
        h = jnp.dot(h, w2.astype(jnp.bfloat16),
                    preferred_element_type=jnp.float32) + b2
        h = jnp.maximum(h, 0.0)                                        # f32
        # Final layer in f32, same multiply+reduce structure as the kernel.
        return jnp.sum(h * w3[:, 0][None, :], axis=-1, keepdims=True) + b3

    q1 = tower(x, w1a, b1a, w2a, b2a, w3a, b3a)
    q2 = tower(x, w1b, b1b, w2b, b2b, w3b, b3b)
    return q1, q2


if __name__ == "__main__":
    key = jax.random.PRNGKey(0)
    k_params, k_state, k_action = jax.random.split(key, 3)

    params = init_params(k_params)
    padded_params = prepare_params(params)       # done once, reused every call

    fwd = jax.jit(double_deep_q_net)

    # Small-batch case (typical RL actor step).
    B = 2
    state = jax.random.normal(k_state, (B, STATE_DIM), jnp.float32)
    action = jax.random.normal(k_action, (B, ACTION_DIM), jnp.float32)
    q1, q2 = fwd(state, action, padded_params)
    jax.block_until_ready((q1, q2))

    r1, r2 = _reference_forward(state, action, params)
    assert q1.shape == (B, 1) and q2.shape == (B, 1)
    assert jnp.allclose(q1, r1, atol=1e-3, rtol=1e-3)
    assert jnp.allclose(q2, r2, atol=1e-3, rtol=1e-3)

    # Larger batch exercising the 256-row batch-tiling path.
    B2 = 300
    k_s2, k_a2 = jax.random.split(jax.random.PRNGKey(1))
    state2 = jax.random.normal(k_s2, (B2, STATE_DIM), jnp.float32)
    action2 = jax.random.normal(k_a2, (B2, ACTION_DIM), jnp.float32)
    q1b, q2b = fwd(state2, action2, padded_params)
    jax.block_until_ready((q1b, q2b))

    r1b, r2b = _reference_forward(state2, action2, params)
    assert q1b.shape == (B2, 1) and q2b.shape == (B2, 1)
    assert jnp.allclose(q1b, r1b, atol=1e-3, rtol=1e-3)
    assert jnp.allclose(q2b, r2b, atol=1e-3, rtol=1e-3)

    print("KERNEL_OK")
</pallas_src>

<mosaic_0001>
module attributes {stable_mosaic.version = 11 : i64} {
  func.func @_ddqn_kernel_merged(%arg0: i32, %arg1: memref<16x32xbf16, #tpu.memory_space<vmem>>, %arg2: memref<2x32x256xbf16, #tpu.memory_space<vmem>>, %arg3: memref<2x1x256xf32, #tpu.memory_space<vmem>>, %arg4: memref<2x256x256xbf16, #tpu.memory_space<vmem>>, %arg5: memref<2x1x256xf32, #tpu.memory_space<vmem>>, %arg6: memref<2x1x256xf32, #tpu.memory_space<vmem>>, %arg7: memref<2xf32, #tpu.memory_space<smem>>, %arg8: memref<2x1x16xf32, #tpu.memory_space<vmem>>) attributes {dimension_semantics = [#tpu.dimension_semantics<parallel>], iteration_bounds = array<i64: 1>, scalar_prefetch = 0 : i64, scratch_operands = 0 : i64, tpu.core_type = #tpu.core_type<tc>, window_params = [{transform_indices = @transform_0, window_bounds = array<i64: 16, 32>}, {pipeline_mode = #tpu.pipeline_mode<synchronous>, transform_indices = @transform_1, window_bounds = array<i64: 2, 32, 256>}, {pipeline_mode = #tpu.pipeline_mode<synchronous>, transform_indices = @transform_2, window_bounds = array<i64: 2, 1, 256>}, {pipeline_mode = #tpu.pipeline_mode<synchronous>, transform_indices = @transform_3, window_bounds = array<i64: 2, 256, 256>}, {pipeline_mode = #tpu.pipeline_mode<synchronous>, transform_indices = @transform_4, window_bounds = array<i64: 2, 1, 256>}, {pipeline_mode = #tpu.pipeline_mode<synchronous>, transform_indices = @transform_5, window_bounds = array<i64: 2, 1, 256>}, {transform_indices = @transform_6, window_bounds = array<i64: 2>}, {transform_indices = @transform_7, window_bounds = array<i64: 2, 1, 16>}]} {
    %c0 = arith.constant 0 : index
    %c0_0 = arith.constant 0 : index
    %0 = vector.load %arg1[%c0, %c0_0] : memref<16x32xbf16, #tpu.memory_space<vmem>>, vector<16x32xbf16>
    %c0_1 = arith.constant 0 : index
    %c0_2 = arith.constant 0 : index
    %c0_3 = arith.constant 0 : index
    %1 = vector.load %arg2[%c0_1, %c0_2, %c0_3] : memref<2x32x256xbf16, #tpu.memory_space<vmem>>, vector<1x32x256xbf16>
    %2 = vector.shape_cast %1 : vector<1x32x256xbf16> to vector<32x256xbf16>
    %cst = arith.constant dense<0.000000e+00> : vector<16x256xf32>
    %3 = tpu.matmul %0, %2, %cst {dimension_numbers = #tpu.dot_dimension_numbers<[1], [0], [0], [1], [0, 0, 1, 1], [], []>} : vector<16x32xbf16>, vector<32x256xbf16>, vector<16x256xf32> -> vector<16x256xf32>
    %c0_4 = arith.constant 0 : index
    %c0_5 = arith.constant 0 : index
    %c0_6 = arith.constant 0 : index
    %4 = vector.load %arg3[%c0_4, %c0_5, %c0_6] : memref<2x1x256xf32, #tpu.memory_space<vmem>>, vector<1x1x256xf32>
    %5 = vector.shape_cast %4 : vector<1x1x256xf32> to vector<1x256xf32>
    %6 = vector.broadcast %5 : vector<1x256xf32> to vector<16x256xf32>
    %7 = arith.addf %3, %6 : vector<16x256xf32>
    %cst_7 = arith.constant 0.000000e+00 : f32
    %8 = vector.broadcast %cst_7 : f32 to vector<16x256xf32>
    %9 = arith.maximumf %7, %8 : vector<16x256xf32>
    %10 = arith.truncf %9 : vector<16x256xf32> to vector<16x256xbf16>
    %c0_8 = arith.constant 0 : index
    %c0_9 = arith.constant 0 : index
    %c0_10 = arith.constant 0 : index
    %11 = vector.load %arg4[%c0_8, %c0_9, %c0_10] : memref<2x256x256xbf16, #tpu.memory_space<vmem>>, vector<1x256x256xbf16>
    %12 = vector.shape_cast %11 : vector<1x256x256xbf16> to vector<256x256xbf16>
    %cst_11 = arith.constant dense<0.000000e+00> : vector<16x256xf32>
    %13 = tpu.matmul %10, %12, %cst_11 {dimension_numbers = #tpu.dot_dimension_numbers<[1], [0], [0], [1], [0, 0, 1, 1], [], []>} : vector<16x256xbf16>, vector<256x256xbf16>, vector<16x256xf32> -> vector<16x256xf32>
    %c0_12 = arith.constant 0 : index
    %c0_13 = arith.constant 0 : index
    %c0_14 = arith.constant 0 : index
    %14 = vector.load %arg5[%c0_12, %c0_13, %c0_14] : memref<2x1x256xf32, #tpu.memory_space<vmem>>, vector<1x1x256xf32>
    %15 = vector.shape_cast %14 : vector<1x1x256xf32> to vector<1x256xf32>
    %16 = vector.broadcast %15 : vector<1x256xf32> to vector<16x256xf32>
    %17 = arith.addf %13, %16 : vector<16x256xf32>
    %cst_15 = arith.constant 0.000000e+00 : f32
    %18 = vector.broadcast %cst_15 : f32 to vector<16x256xf32>
    %19 = arith.maximumf %17, %18 : vector<16x256xf32>
    %c0_16 = arith.constant 0 : index
    %c0_17 = arith.constant 0 : index
    %c0_18 = arith.constant 0 : index
    %20 = vector.load %arg6[%c0_16, %c0_17, %c0_18] : memref<2x1x256xf32, #tpu.memory_space<vmem>>, vector<1x1x256xf32>
    %21 = vector.shape_cast %20 : vector<1x1x256xf32> to vector<1x256xf32>
    %22 = vector.broadcast %21 : vector<1x256xf32> to vector<16x256xf32>
    %23 = arith.mulf %19, %22 : vector<16x256xf32>
    %cst_19 = arith.constant dense<0.000000e+00> : vector<16xf32>
    %24 = vector.multi_reduction <add>, %23, %cst_19 [1] : vector<16x256xf32> to vector<16xf32>
    %c0_20 = arith.constant 0 : index
    %25 = memref.load %arg7[%c0_20] : memref<2xf32, #tpu.memory_space<smem>>
    %26 = vector.broadcast %25 : f32 to vector<16xf32>
    %27 = arith.addf %24, %26 : vector<16xf32>
    %28 = vector.shape_cast %27 : vector<16xf32> to vector<1x16xf32>
    %c0_21 = arith.constant 0 : index
    %c0_22 = arith.constant 0 : index
    %c0_23 = arith.constant 0 : index
    %29 = vector.load %arg8[%c0_21, %c0_22, %c0_23] : memref<2x1x16xf32, #tpu.memory_space<vmem>>, vector<1x1x16xf32>
    %30 = vector.shape_cast %29 : vector<1x1x16xf32> to vector<1x16xf32>
    %31 = vector.shape_cast %28 : vector<1x16xf32> to vector<1x1x16xf32>
    tpu.vector_store %arg8[%c0_21, %c0_22, %c0_23], %31 {strides = array<i32>} : memref<2x1x16xf32, #tpu.memory_space<vmem>>, vector<1x1x16xf32>,
    %c1 = arith.constant 1 : index
    %c0_24 = arith.constant 0 : index
    %c0_25 = arith.constant 0 : index
    %32 = vector.load %arg2[%c1, %c0_24, %c0_25] : memref<2x32x256xbf16, #tpu.memory_space<vmem>>, vector<1x32x256xbf16>
    %33 = vector.shape_cast %32 : vector<1x32x256xbf16> to vector<32x256xbf16>
    %cst_26 = arith.constant dense<0.000000e+00> : vector<16x256xf32>
    %34 = tpu.matmul %0, %33, %cst_26 {dimension_numbers = #tpu.dot_dimension_numbers<[1], [0], [0], [1], [0, 0, 1, 1], [], []>} : vector<16x32xbf16>, vector<32x256xbf16>, vector<16x256xf32> -> vector<16x256xf32>
    %c1_27 = arith.constant 1 : index
    %c0_28 = arith.constant 0 : index
    %c0_29 = arith.constant 0 : index
    %35 = vector.load %arg3[%c1_27, %c0_28, %c0_29] : memref<2x1x256xf32, #tpu.memory_space<vmem>>, vector<1x1x256xf32>
    %36 = vector.shape_cast %35 : vector<1x1x256xf32> to vector<1x256xf32>
    %37 = vector.broadcast %36 : vector<1x256xf32> to vector<16x256xf32>
    %38 = arith.addf %34, %37 : vector<16x256xf32>
    %cst_30 = arith.constant 0.000000e+00 : f32
    %39 = vector.broadcast %cst_30 : f32 to vector<16x256xf32>
    %40 = arith.maximumf %38, %39 : vector<16x256xf32>
    %41 = arith.truncf %40 : vector<16x256xf32> to vector<16x256xbf16>
    %c1_31 = arith.constant 1 : index
    %c0_32 = arith.constant 0 : index
    %c0_33 = arith.constant 0 : index
    %42 = vector.load %arg4[%c1_31, %c0_32, %c0_33] : memref<2x256x256xbf16, #tpu.memory_space<vmem>>, vector<1x256x256xbf16>
    %43 = vector.shape_cast %42 : vector<1x256x256xbf16> to vector<256x256xbf16>
    %cst_34 = arith.constant dense<0.000000e+00> : vector<16x256xf32>
    %44 = tpu.matmul %41, %43, %cst_34 {dimension_numbers = #tpu.dot_dimension_numbers<[1], [0], [0], [1], [0, 0, 1, 1], [], []>} : vector<16x256xbf16>, vector<256x256xbf16>, vector<16x256xf32> -> vector<16x256xf32>
    %c1_35 = arith.constant 1 : index
    %c0_36 = arith.constant 0 : index
    %c0_37 = arith.constant 0 : index
    %45 = vector.load %arg5[%c1_35, %c0_36, %c0_37] : memref<2x1x256xf32, #tpu.memory_space<vmem>>, vector<1x1x256xf32>
    %46 = vector.shape_cast %45 : vector<1x1x256xf32> to vector<1x256xf32>
    %47 = vector.broadcast %46 : vector<1x256xf32> to vector<16x256xf32>
    %48 = arith.addf %44, %47 : vector<16x256xf32>
    %cst_38 = arith.constant 0.000000e+00 : f32
    %49 = vector.broadcast %cst_38 : f32 to vector<16x256xf32>
    %50 = arith.maximumf %48, %49 : vector<16x256xf32>
    %c1_39 = arith.constant 1 : index
    %c0_40 = arith.constant 0 : index
    %c0_41 = arith.constant 0 : index
    %51 = vector.load %arg6[%c1_39, %c0_40, %c0_41] : memref<2x1x256xf32, #tpu.memory_space<vmem>>, vector<1x1x256xf32>
    %52 = vector.shape_cast %51 : vector<1x1x256xf32> to vector<1x256xf32>
    %53 = vector.broadcast %52 : vector<1x256xf32> to vector<16x256xf32>
    %54 = arith.mulf %50, %53 : vector<16x256xf32>
    %cst_42 = arith.constant dense<0.000000e+00> : vector<16xf32>
    %55 = vector.multi_reduction <add>, %54, %cst_42 [1] : vector<16x256xf32> to vector<16xf32>
    %c1_43 = arith.constant 1 : index
    %56 = memref.load %arg7[%c1_43] : memref<2xf32, #tpu.memory_space<smem>>
    %57 = vector.broadcast %56 : f32 to vector<16xf32>
    %58 = arith.addf %55, %57 : vector<16xf32>
    %59 = vector.shape_cast %58 : vector<16xf32> to vector<1x16xf32>
    %c1_44 = arith.constant 1 : index
    %c0_45 = arith.constant 0 : index
    %c0_46 = arith.constant 0 : index
    %60 = vector.load %arg8[%c1_44, %c0_45, %c0_46] : memref<2x1x16xf32, #tpu.memory_space<vmem>>, vector<1x1x16xf32>
    %61 = vector.shape_cast %60 : vector<1x1x16xf32> to vector<1x16xf32>
    %62 = vector.shape_cast %59 : vector<1x16xf32> to vector<1x1x16xf32>
    tpu.vector_store %arg8[%c1_44, %c0_45, %c0_46], %62 {strides = array<i32>} : memref<2x1x16xf32, #tpu.memory_space<vmem>>, vector<1x1x16xf32>,
    return
  }
  func.func @transform_0(%arg0: i32) -> (i32, i32) {
    %c0_i32 = arith.constant 0 : i32
    %c0_i32_0 = arith.constant 0 : i32
    return %arg0, %c0_i32 : i32, i32
  }
  func.func @transform_1(%arg0: i32) -> (i32, i32, i32) {
    %c0_i32 = arith.constant 0 : i32
    %c0_i32_0 = arith.constant 0 : i32
    %c0_i32_1 = arith.constant 0 : i32
    %c0_i32_2 = arith.constant 0 : i32
    return %c0_i32, %c0_i32_0, %c0_i32_1 : i32, i32, i32
  }
  func.func @transform_2(%arg0: i32) -> (i32, i32, i32) {
    %c0_i32 = arith.constant 0 : i32
    %c0_i32_0 = arith.constant 0 : i32
    %c0_i32_1 = arith.constant 0 : i32
    %c0_i32_2 = arith.constant 0 : i32
    return %c0_i32, %c0_i32_0, %c0_i32_1 : i32, i32, i32
  }
  func.func @transform_3(%arg0: i32) -> (i32, i32, i32) {
    %c0_i32 = arith.constant 0 : i32
    %c0_i32_0 = arith.constant 0 : i32
    %c0_i32_1 = arith.constant 0 : i32
    %c0_i32_2 = arith.constant 0 : i32
    return %c0_i32, %c0_i32_0, %c0_i32_1 : i32, i32, i32
  }
  func.func @transform_4(%arg0: i32) -> (i32, i32, i32) {
    %c0_i32 = arith.constant 0 : i32
    %c0_i32_0 = arith.constant 0 : i32
    %c0_i32_1 = arith.constant 0 : i32
    %c0_i32_2 = arith.constant 0 : i32
    return %c0_i32, %c0_i32_0, %c0_i32_1 : i32, i32, i32
  }
  func.func @transform_5(%arg0: i32) -> (i32, i32, i32) {
    %c0_i32 = arith.constant 0 : i32
    %c0_i32_0 = arith.constant 0 : i32
    %c0_i32_1 = arith.constant 0 : i32
    %c0_i32_2 = arith.constant 0 : i32
    return %c0_i32, %c0_i32_0, %c0_i32_1 : i32, i32, i32
  }
  func.func @transform_6(%arg0: i32) -> i32 {
    %c0_i32 = arith.constant 0 : i32
    %c0_i32_0 = arith.constant 0 : i32
    return %c0_i32 : i32
  }
  func.func @transform_7(%arg0: i32) -> (i32, i32, i32) {
    %c0_i32 = arith.constant 0 : i32
    %c0_i32_0 = arith.constant 0 : i32
    %c0_i32_1 = arith.constant 0 : i32
    return %c0_i32, %c0_i32_0, %arg0 : i32, i32, i32
  }
}

</mosaic_0001>

<bundles_post_ra>
// kernel: double_deep_q_net.1
= control target key start
LH: loop header
LB: loop body
LE: loop exit
PB: predicated region body
PF: predicated region fallthrough
CT: control target
= control target key end

     0   :  { %12 = vsyncpa [#allocation3], 0  ;;  %s1343_s0 = inlined_call_operand.vmem [shape: bf16[16,32], index: 0, kind: input, shape index: {}]   ;;  %s1344_s1 = inlined_call_operand.hbm [shape: bf16[2,32,256], index: 1, kind: input, shape index: {}]   ;;  %s1345_s2 = inlined_call_operand.vmem [shape: f32[2,1,256], index: 2, kind: input, shape index: {}]   ;;  %s1346_s3 = inlined_call_operand.hbm [shape: bf16[2,256,256], index: 3, kind: input, shape index: {}]   ;;  %s1347_s4 = inlined_call_operand.vmem [shape: f32[2,1,256], index: 4, kind: input, shape index: {}]   ;;  %s1348_s5 = inlined_call_operand.vmem [shape: f32[2,1,256], index: 5, kind: input, shape index: {}]   ;;  %s1349_s6 = inlined_call_operand.vmem [shape: f32[2], index: 6, kind: input, shape index: {}]   ;;  %s1350_s7 = inlined_call_operand.vmem [shape: f32[2,1,16], index: 7, kind: output, shape index: {}]  }
   0x1   :  { %13 = vsyncpa [#allocation6], 0  ;;  %s21_s26 = sshll.u32 %s1344_s1, 4  ;;  %s22_s26 = int_to_ptr.hbm [resolvable:$true] %s21_s26 }
   0x2   :  { %14 = vsyncpa [#allocation4], 0  ;;  %s1244_s27 = smov [#allocation2]   ;;  %s36_s8 = sshll.u32 %s1346_s3, 4  ;;  %s37_s8 = int_to_ptr.hbm [resolvable:$true] %s36_s8 }
   0x3   :  { %s23_s28 = sshll.u32 %s1244_s27, 4  ;;  %s1245_s9 = smov 128   ;;  %s24_s28 = int_to_ptr.vmem [resolvable:$true] %s23_s28 }
   0x4   :  { %s1246_s10 = smov 8   ;;  %s1247_s11 = smov [#allocation5]  }
   0x5   :  { %29 = dma.hbm_to_vmem [thread:$0]  %s22_s26, 1024, %s24_s28, [#allocation3], %s1245_s9, %s1245_s9, %s1246_s10  }
   0x6   :  { %s38_s12 = sshll.u32 %s1247_s11, 4  ;;  %s54_s15 = sshll.u32 %s1349_s6, 4  ;;  %s39_s12 = int_to_ptr.vmem [resolvable:$true] %s38_s12  ;;  %s55_s15 = int_to_ptr.vmem [resolvable:$true] %s54_s15 }
   0x7   :  { %44 = dma.hbm_to_vmem [thread:$0]  %s37_s8, 8192, %s39_s12, [#allocation6], %s1245_s9, %s1245_s9, %s1246_s10  }
   0x8   :  { %s1248_s1 = smov [#allocation7]  }
   0x9   :  { %57 = dma.vmem_to_smem %s55_s15, 16, %s1248_s1, [#allocation4]  }
   0xa   :  { %1238 = dma.done.wait [#allocation3], 1024  }
   0xb   :  { %1239 = vsyncadd [#allocation3], 4294966272 }
   0xc   :  { %1240 = dma.done.wait [#allocation6], 8192  }
   0xd   :  { %1241 = vsyncadd [#allocation6], 4294959104 }
   0xe   :  { %1242 = dma.done.wait [#allocation4], 16  }
   0xf   :  { %1243 = vsyncadd [#allocation4], 4294967280 }
  0x10   :  { %70 = sfence }
  0x11   :  { %v813_v0 = vld [vmem:[#allocation2 + $0x10] sm:$0xf]  ;;  %v1104_v1 = vld [vmem:[#allocation2 + $0x14] sm:$0xf0]  ;;  %v1103_v2 = vld [vmem:[#allocation2 + $0x14] sm:$0xf] }
  0x12   :  { %v814_v3 = vor.u32 %v1104_v1, %v813_v0  ;;  %v815_v4 = vld [vmem:[#allocation2 + $0x18] sm:$0xf0]  ;;  %v805_v5 = vld [vmem:[#allocation2] sm:$0xf]  ;;  %v1102_v6 = vld [vmem:[#allocation2 + $0x4] sm:$0xf0] }
  0x13   :  { %v818_v7 = vor.u32 %v1103_v2, %v815_v4  ;;  %v1101_v8 = vld [vmem:[#allocation2 + $0x4] sm:$0xf]  ;;  %v807_v9 = vld [vmem:[#allocation2 + $0x8] sm:$0xf0]  ;;  %vm109_vm0 = vcmask 261120   ;;  %v806_v10 = vor.u32 %v1102_v6, %v805_v5  ;;  %vm432_vm1 = vcmask 130112  }
  0x14   :  { %119 = vmatpush.bf16.msra.mxu0 %v814_v3  ;;  %v879_v11 = vld [vmem:[#allocation5 + $0x70] sm:$0xf]  ;;  %v1120_v12 = vld [vmem:[#allocation5 + $0x74] sm:$0xf0]  ;;  %v810_v14 = vor.u32 %v1101_v8, %v807_v9  ;;  %v1301_v15 = vld [vmem:[%s1343_s0] sm:$0xff]  ;;  %vm435_vm2 = vcmask 122880  }
  0x15   :  { %v943_v13 = vld [vmem:[#allocation5 + $0xf0] sm:$0xf]  ;;  %133 = vmatpush.bf16.msra.mxu1 %v818_v7  ;;  %v880_v16 = vor.u32 %v1120_v12, %v879_v11  ;;  %v1136_v17 = vld [vmem:[#allocation5 + $0xf4] sm:$0xf0]  ;;  %v1119_v18 = vld [vmem:[#allocation5 + $0x74] sm:$0xf] }
  0x16   :  { %v881_v19 = vld [vmem:[#allocation5 + $0x78] sm:$0xf0]  ;;  %v944_v20 = vor.u32 %v1136_v17, %v943_v13  ;;  %v1135_v22 = vld [vmem:[#allocation5 + $0xf4] sm:$0xf]  ;;  %v871_v24 = vld [vmem:[#allocation5 + $0x60] sm:$0xf] }
  0x17   :  { %v884_v21 = vor.u32 %v1119_v18, %v881_v19  ;;  %v945_v23 = vld [vmem:[#allocation5 + $0xf8] sm:$0xf0]  ;;  %345 = vmatpush.bf16.msra.mxu2 %v880_v16  ;;  %v1118_v26 = vld [vmem:[#allocation5 + $0x64] sm:$0xf0]  ;;  %v935_v27 = vld [vmem:[#allocation5 + $0xe0] sm:$0xf] }
  0x18   :  { %v948_v25 = vor.u32 %v1135_v22, %v945_v23  ;;  %v1134_v28 = vld [vmem:[#allocation5 + $0xe4] sm:$0xf0]  ;;  %120 = vmatpush.bf16.msra.mxu0 %v806_v10  ;;  %359 = vmatpush.bf16.msra.mxu3 %v944_v20  ;;  %v872_v29 = vor.u32 %v1118_v26, %v871_v24  ;;  %v1117_v31 = vld [vmem:[#allocation5 + $0x64] sm:$0xf]  ;;  %v873_v32 = vld [vmem:[#allocation5 + $0x68] sm:$0xf0] }
  0x19   :  { %v936_v30 = vor.u32 %v1134_v28, %v935_v27  ;;  %v1133_v33 = vld [vmem:[#allocation5 + $0xe4] sm:$0xf]  ;;  %134 = vmatpush.bf16.msra.mxu1 %v810_v14  ;;  %v876_v34 = vor.u32 %v1117_v31, %v873_v32  ;;  %v937_v35 = vld [vmem:[#allocation5 + $0xe8] sm:$0xf0]  ;;  %v863_v36 = vld [vmem:[#allocation5 + $0x50] sm:$0xf] }
  0x1a   :  { %v1116_v37 = vld [vmem:[#allocation5 + $0x54] sm:$0xf0]  ;;  %v940_v38 = vor.u32 %v1133_v33, %v937_v35  ;;  %v927_v39 = vld [vmem:[#allocation5 + $0xd0] sm:$0xf]  ;;  %v1115_v41 = vld [vmem:[#allocation5 + $0x54] sm:$0xf] }
  0x1b   :  { %v1132_v40 = vld [vmem:[#allocation5 + $0xd4] sm:$0xf0]  ;;  %819 = vmatmul.msk.bf16.vlgmr.msra.gmra.mxu0 %vm109_vm0, %v1301_v15  ;;  %346 = vmatpush.bf16.msra.mxu2 %v872_v29  ;;  %v864_v42 = vor.u32 %v1116_v37, %v863_v36  ;;  %v865_v43 = vld [vmem:[#allocation5 + $0x58] sm:$0xf0]  ;;  %v1131_v44 = vld [vmem:[#allocation5 + $0xd4] sm:$0xf] }
  0x1c   :  { %373 = vmatpush.bf16.msrb.mxu0 %v884_v21  ;;  %v929_v45 = vld [vmem:[#allocation5 + $0xd8] sm:$0xf0]  ;;  %820 = vmatmul.msk.bf16.vlgmr.msra.gmra.mxu1 %vm109_vm0, %v1301_v15  ;;  %v928_v46 = vor.u32 %v1132_v40, %v927_v39  ;;  %v855_v47 = vld [vmem:[#allocation5 + $0x40] sm:$0xf]  ;;  %v1114_v48 = vld [vmem:[#allocation5 + $0x44] sm:$0xf0]  ;;  %v868_v49 = vor.u32 %v1115_v41, %v865_v43 }
  0x1d   :  { %387 = vmatpush.bf16.msrb.mxu1 %v948_v25  ;;  %360 = vmatpush.bf16.msra.mxu3 %v936_v30  ;;  %v919_v50 = vld [vmem:[#allocation5 + $0xc0] sm:$0xf]  ;;  %v1130_v51 = vld [vmem:[#allocation5 + $0xc4] sm:$0xf0]  ;;  %v932_v52 = vor.u32 %v1131_v44, %v929_v45  ;;  %v1113_v53 = vld [vmem:[#allocation5 + $0x44] sm:$0xf]  ;;  %v856_v55 = vor.u32 %v1114_v48, %v855_v47 }
  0x1e   :  { %v857_v54 = vld [vmem:[#allocation5 + $0x48] sm:$0xf0]  ;;  %v1129_v56 = vld [vmem:[#allocation5 + $0xc4] sm:$0xf]  ;;  %v920_v58 = vor.u32 %v1130_v51, %v919_v50  ;;  %v847_v61 = vld [vmem:[#allocation5 + $0x30] sm:$0xf] }
  0x1f   :  { %347 = vmatpush.bf16.msra.mxu2 %v864_v42  ;;  %v921_v57 = vld [vmem:[#allocation5 + $0xc8] sm:$0xf0]  ;;  %v860_v59 = vor.u32 %v1113_v53, %v857_v54  ;;  %v1112_v62 = vld [vmem:[#allocation5 + $0x34] sm:$0xf0]  ;;  %v911_v63 = vld [vmem:[#allocation5 + $0xb0] sm:$0xf] }
  0x20   :  { %374 = vmatpush.bf16.msrb.mxu0 %v876_v34  ;;  %v924_v60 = vor.u32 %v1129_v56, %v921_v57  ;;  %v848_v0 = vor.u32 %v1112_v62, %v847_v61  ;;  %v1128_v1 = vld [vmem:[#allocation5 + $0xb4] sm:$0xf0]  ;;  %v1111_v2 = vld [vmem:[#allocation5 + $0x34] sm:$0xf]  ;;  %v849_v3 = vld [vmem:[#allocation5 + $0x38] sm:$0xf0] }
  0x21   :  { %388 = vmatpush.bf16.msrb.mxu1 %v940_v38  ;;  %361 = vmatpush.bf16.msra.mxu3 %v928_v46  ;;  %v912_v4 = vor.u32 %v1128_v1, %v911_v63  ;;  %v852_v5 = vor.u32 %v1111_v2, %v849_v3  ;;  %v1127_v6 = vld [vmem:[#allocation5 + $0xb4] sm:$0xf]  ;;  %v913_v7 = vld [vmem:[#allocation5 + $0xb8] sm:$0xf0]  ;;  %v839_v9 = vld [vmem:[#allocation5 + $0x20] sm:$0xf] }
  0x22   :  { %v916_v8 = vor.u32 %v1127_v6, %v913_v7  ;;  %v1110_v10 = vld [vmem:[#allocation5 + $0x24] sm:$0xf0]  ;;  %v903_v12 = vld [vmem:[#allocation5 + $0xa0] sm:$0xf]  ;;  %v1109_v14 = vld [vmem:[#allocation5 + $0x24] sm:$0xf] }
  0x23   :  { %348 = vmatpush.bf16.msra.mxu2 %v856_v55  ;;  %v840_v11 = vor.u32 %v1110_v10, %v839_v9  ;;  %v1126_v13 = vld [vmem:[#allocation5 + $0xa4] sm:$0xf0]  ;;  %v841_v17 = vld [vmem:[#allocation5 + $0x28] sm:$0xf0]  ;;  %v1125_v18 = vld [vmem:[#allocation5 + $0xa4] sm:$0xf] }
  0x24   :  { %375 = vmatpush.bf16.msrb.mxu0 %v868_v49  ;;  %v904_v16 = vor.u32 %v1126_v13, %v903_v12  ;;  %v905_v19 = vld [vmem:[#allocation5 + $0xa8] sm:$0xf0]  ;;  %v844_v20 = vor.u32 %v1109_v14, %v841_v17  ;;  %v831_v22 = vld [vmem:[#allocation5 + $0x10] sm:$0xf]  ;;  %v1108_v23 = vld [vmem:[#allocation5 + $0x14] sm:$0xf0] }
  0x25   :  { %389 = vmatpush.bf16.msrb.mxu1 %v932_v52  ;;  %362 = vmatpush.bf16.msra.mxu3 %v920_v58  ;;  %v908_v21 = vor.u32 %v1125_v18, %v905_v19  ;;  %v895_v24 = vld [vmem:[#allocation5 + $0x90] sm:$0xf]  ;;  %v832_v25 = vor.u32 %v1108_v23, %v831_v22  ;;  %v1124_v26 = vld [vmem:[#allocation5 + $0x94] sm:$0xf0]  ;;  %v1107_v27 = vld [vmem:[#allocation5 + $0x14] sm:$0xf] }
  0x26   :  { %v833_v28 = vld [vmem:[#allocation5 + $0x18] sm:$0xf0]  ;;  %v896_v29 = vor.u32 %v1124_v26, %v895_v24  ;;  %v1123_v31 = vld [vmem:[#allocation5 + $0x94] sm:$0xf]  ;;  %v823_v34 = vld [vmem:[#allocation5] sm:$0xf] }
  0x27   :  { %349 = vmatpush.bf16.msra.mxu2 %v848_v0  ;;  %v836_v30 = vor.u32 %v1107_v27, %v833_v28  ;;  %v897_v32 = vld [vmem:[#allocation5 + $0x98] sm:$0xf0]  ;;  %v1106_v35 = vld [vmem:[#allocation5 + $0x4] sm:$0xf0]  ;;  %v887_v36 = vld [vmem:[#allocation5 + $0x80] sm:$0xf] }
  0x28   :  { %376 = vmatpush.bf16.msrb.mxu0 %v860_v59  ;;  %v900_v33 = vor.u32 %v1123_v31, %v897_v32  ;;  %v824_v37 = vor.u32 %v1106_v35, %v823_v34  ;;  %v1122_v38 = vld [vmem:[#allocation5 + $0x84] sm:$0xf0]  ;;  %v1105_v39 = vld [vmem:[#allocation5 + $0x4] sm:$0xf]  ;;  %v825_v40 = vld [vmem:[#allocation5 + $0x8] sm:$0xf0] }
  0x29   :  { %390 = vmatpush.bf16.msrb.mxu1 %v924_v60  ;;  %363 = vmatpush.bf16.msra.mxu3 %v912_v4  ;;  %v888_v41 = vor.u32 %v1122_v38, %v887_v36  ;;  %v828_v42 = vor.u32 %v1105_v39, %v825_v40  ;;  %v1121_v43 = vld [vmem:[#allocation5 + $0x84] sm:$0xf]  ;;  %v889_v44 = vld [vmem:[#allocation5 + $0x88] sm:$0xf0]  ;;  %v960_v46 = vld [vmem:[#allocation2 + $0x30] sm:$0xf] }
  0x2a   :  { %v892_v45 = vor.u32 %v1121_v43, %v889_v44  ;;  %v1140_v47 = vld [vmem:[#allocation2 + $0x34] sm:$0xf0]  ;;  %v1139_v48 = vld [vmem:[#allocation2 + $0x34] sm:$0xf]  ;;  %v962_v50 = vld [vmem:[#allocation2 + $0x38] sm:$0xf0] }
  0x2b   :  { %350 = vmatpush.bf16.msra.mxu2 %v840_v11  ;;  %v961_v49 = vor.u32 %v1140_v47, %v960_v46  ;;  %v952_v51 = vld [vmem:[#allocation2 + $0x20] sm:$0xf]  ;;  %v1138_v52 = vld [vmem:[#allocation2 + $0x24] sm:$0xf0]  ;;  %v965_v53 = vor.u32 %v1139_v48, %v962_v50  ;;  %v1137_v54 = vld [vmem:[#allocation2 + $0x24] sm:$0xf] }
  0x2c   :  { %377 = vmatpush.bf16.msrb.mxu0 %v852_v5  ;;  %v954_v55 = vld [vmem:[#allocation2 + $0x28] sm:$0xf0]  ;;  %v953_v56 = vor.u32 %v1138_v52, %v952_v51  ;;  %v78_v58 = vld [vmem:[%s1345_s2] sm:$0x3]  ;;  %v1027_v11 = vld [vmem:[#allocation5 + $0x170] sm:$0xf] }
  0x2d   :  { %391 = vmatpush.bf16.msrb.mxu1 %v916_v8  ;;  %364 = vmatpush.bf16.msra.mxu3 %v904_v16  ;;  %v957_v57 = vor.u32 %v1137_v54, %v954_v55  ;;  %v80_v61 = vperm.slane %v78_v58, 0  ;;  %v81_v62 = vperm.slane %v78_v58, 1  ;;  %v1156_v12 = vld [vmem:[#allocation5 + $0x174] sm:$0xf0]  ;;  %v1091_v13 = vld [vmem:[#allocation5 + $0x1f0] sm:$0xf] }
  0x2e   :  { %v1028_v14 = vor.u32 %v1156_v12, %v1027_v11  ;;  %v1172_v16 = vld [vmem:[#allocation5 + $0x1f4] sm:$0xf0]  ;;  %v1155_v17 = vld [vmem:[#allocation5 + $0x174] sm:$0xf]  ;;  %v1029_v19 = vld [vmem:[#allocation5 + $0x178] sm:$0xf0] }
  0x2f   :  { %351 = vmatpush.bf16.msra.mxu2 %v832_v25  ;;  %v1092_v18 = vor.u32 %v1172_v16, %v1091_v13  ;;  %v1032_v22 = vor.u32 %v1155_v17, %v1029_v19  ;;  %v1019_v24 = vld [vmem:[#allocation5 + $0x160] sm:$0xf]  ;;  %v1154_v25 = vld [vmem:[#allocation5 + $0x164] sm:$0xf0]  ;;  %v1153_v28 = vld [vmem:[#allocation5 + $0x164] sm:$0xf] }
  0x30   :  { %378 = vmatpush.bf16.msrb.mxu0 %v844_v20  ;;  %v1171_v20 = vld [vmem:[#allocation5 + $0x1f4] sm:$0xf]  ;;  %v1020_v26 = vor.u32 %v1154_v25, %v1019_v24  ;;  %v1170_v27 = vld [vmem:[#allocation5 + $0x1e4] sm:$0xf0]  ;;  %v1169_v31 = vld [vmem:[#allocation5 + $0x1e4] sm:$0xf] }
  0x31   :  { %392 = vmatpush.bf16.msrb.mxu1 %v908_v21  ;;  %365 = vmatpush.bf16.msra.mxu3 %v896_v29  ;;  %v1093_v21 = vld [vmem:[#allocation5 + $0x1f8] sm:$0xf0]  ;;  %v1085_v32 = vld [vmem:[#allocation5 + $0x1e8] sm:$0xf0]  ;;  %v1011_v35 = vld [vmem:[#allocation5 + $0x150] sm:$0xf] }
  0x32   :  { %v1096_v23 = vor.u32 %v1171_v20, %v1093_v21  ;;  %v1088_v34 = vor.u32 %v1169_v31, %v1085_v32  ;;  %v1152_v36 = vld [vmem:[#allocation5 + $0x154] sm:$0xf0]  ;;  %v1075_v38 = vld [vmem:[#allocation5 + $0x1d0] sm:$0xf]  ;;  %v1151_v40 = vld [vmem:[#allocation5 + $0x154] sm:$0xf] }
  0x33   :  { %352 = vmatpush.bf16.msra.mxu2 %v824_v37  ;;  %v1012_v37 = vor.u32 %v1152_v36, %v1011_v35  ;;  %v1168_v39 = vld [vmem:[#allocation5 + $0x1d4] sm:$0xf0]  ;;  %v1167_v43 = vld [vmem:[#allocation5 + $0x1d4] sm:$0xf]  ;;  %v1077_v44 = vld [vmem:[#allocation5 + $0x1d8] sm:$0xf0] }
  0x34   :  { %379 = vmatpush.bf16.msrb.mxu0 %v836_v30  ;;  %v1021_v30 = vld [vmem:[#allocation5 + $0x168] sm:$0xf0]  ;;  %v1080_v46 = vor.u32 %v1167_v43, %v1077_v44  ;;  %v1003_v47 = vld [vmem:[#allocation5 + $0x140] sm:$0xf]  ;;  %v1150_v48 = vld [vmem:[#allocation5 + $0x144] sm:$0xf0] }
  0x35   :  { %393 = vmatpush.bf16.msrb.mxu1 %v900_v33  ;;  %366 = vmatpush.bf16.msra.mxu3 %v888_v41  ;;  %v1024_v33 = vor.u32 %v1153_v28, %v1021_v30  ;;  %v1076_v41 = vor.u32 %v1168_v39, %v1075_v38  ;;  %v1004_v50 = vor.u32 %v1150_v48, %v1003_v47  ;;  %v1166_v51 = vld [vmem:[#allocation5 + $0x1c4] sm:$0xf0]  ;;  %v1149_v52 = vld [vmem:[#allocation5 + $0x144] sm:$0xf]  ;;  %v1051_v11 = vld [vmem:[#allocation5 + $0x1a0] sm:$0xf] }
  0x36   :  { %v1162_v12 = vld [vmem:[#allocation5 + $0x1a4] sm:$0xf0]  ;;  %v1145_v13 = vld [vmem:[#allocation5 + $0x124] sm:$0xf]  ;;  %v989_v16 = vld [vmem:[#allocation5 + $0x128] sm:$0xf0] }
  0x37   :  { %475 = vmatpush.bf16.msrb.mxu2 %v961_v49  ;;  %v1067_v49 = vld [vmem:[#allocation5 + $0x1c0] sm:$0xf]  ;;  %v1161_v17 = vld [vmem:[#allocation5 + $0x1a4] sm:$0xf]  ;;  %v992_v20 = vor.u32 %v1145_v13, %v989_v16  ;;  %v1043_v24 = vld [vmem:[#allocation5 + $0x190] sm:$0xf] }
  0x38   :  { %380 = vmatpush.bf16.msrb.mxu0 %v828_v42  ;;  %v1013_v42 = vld [vmem:[#allocation5 + $0x158] sm:$0xf0]  ;;  %v1068_v54 = vor.u32 %v1166_v51, %v1067_v49  ;;  %v1159_v30 = vld [vmem:[#allocation5 + $0x194] sm:$0xf]  ;;  %v1142_v35 = vld [vmem:[#allocation5 + $0x104] sm:$0xf0] }
  0x39   :  { %394 = vmatpush.bf16.msrb.mxu1 %v892_v45  ;;  %489 = vmatpush.bf16.msrb.mxu3 %v965_v53  ;;  %v1016_v45 = vor.u32 %v1151_v40, %v1013_v42  ;;  %v1005_v53 = vld [vmem:[#allocation5 + $0x148] sm:$0xf0]  ;;  %v1045_v31 = vld [vmem:[#allocation5 + $0x198] sm:$0xf0]  ;;  %v1035_v36 = vld [vmem:[#allocation5 + $0x180] sm:$0xf] }
  0x3a   :  { %v1008_v55 = vor.u32 %v1149_v52, %v1005_v53  ;;  %v1048_v32 = vor.u32 %v1159_v30, %v1045_v31  ;;  %v1158_v39 = vld [vmem:[#allocation5 + $0x184] sm:$0xf0]  ;;  %v1141_v40 = vld [vmem:[#allocation5 + $0x104] sm:$0xf] }
  0x3b   :  { %476 = vmatpush.bf16.msrb.mxu2 %v953_v56  ;;  %v1165_v56 = vld [vmem:[#allocation5 + $0x1c4] sm:$0xf]  ;;  %v1036_v43 = vor.u32 %v1158_v39, %v1035_v36  ;;  %v968_v39 = vld [vmem:[%s1347_s4 + $0x2] sm:$0x3] }
  0x3c   :  { %703 = vmatpush.bf16.msra.mxu0 %v1028_v14  ;;  %v1052_v14 = vor.u32 %v1162_v12, %v1051_v11 }
  0x3d   :  { %490 = vmatpush.bf16.msrb.mxu3 %v957_v57  ;;  %717 = vmatpush.bf16.msra.mxu1 %v1092_v18  ;;  %v1069_v57 = vld [vmem:[#allocation5 + $0x1c8] sm:$0xf0] }
  0x3e   :  { %v1072_v58 = vor.u32 %v1165_v56, %v1069_v57  ;;  %v1053_v18 = vld [vmem:[#allocation5 + $0x1a8] sm:$0xf0] }
  0x3f   :  { %v1056_v21 = vor.u32 %v1161_v17, %v1053_v18 }
  0x40   :  { %704 = vmatpush.bf16.msra.mxu0 %v1020_v26  ;;  %v1160_v26 = vld [vmem:[#allocation5 + $0x194] sm:$0xf0] }
  0x41   :  { %v1044_v28 = vor.u32 %v1160_v26, %v1043_v24 }
  0x44   :  { %705 = vmatpush.bf16.msra.mxu0 %v1012_v37 }
  0x48   :  { %706 = vmatpush.bf16.msra.mxu0 %v1004_v50  ;;  %v405_v50 = vld [vmem:[%s1348_s5] sm:$0x3] }
  0x98   :  { %v122_v59 = vpop.f32.mrf.mxu0 }
  0x99   :  { %v136_v60 = vpop.f32.mrf.mxu1  ;;  %v123_v63 = vadd.f32 %v122_v59, %v80_v61  ;;  %v995_v59 = vld [vmem:[#allocation5 + $0x130] sm:$0xf] }
  0x9a   :  { %v137_v0 = vadd.f32 %v136_v60, %v81_v62  ;;  %v1148_v60 = vld [vmem:[#allocation5 + $0x134] sm:$0xf0] }
  0x9b   :  { %v141_v5 = vmax.f32 %v123_v63, 0.0  ;;  %v1164_v63 = vld [vmem:[#allocation5 + $0x1b4] sm:$0xf0] }
  0x9c   :  { %v142_v7 = vmax.f32 %v137_v0, 0.0  ;;  %v1147_v0 = vld [vmem:[#allocation5 + $0x134] sm:$0xf] }
  0xa0   :  { %v124_v1 = vpop.f32.mrf.mxu0 }
  0xa1   :  { %v125_v2 = vadd.f32 %v124_v1, %v80_v61  ;;  %v138_v3 = vpop.f32.mrf.mxu1  ;;  %v1059_v61 = vld [vmem:[#allocation5 + $0x1b0] sm:$0xf] }
  0xa2   :  { %v139_v4 = vadd.f32 %v138_v3, %v81_v62  ;;  %v996_v62 = vor.u32 %v1148_v60, %v995_v59  ;;  %v1060_v1 = vor.u32 %v1164_v63, %v1059_v61  ;;  %v1163_v3 = vld [vmem:[#allocation5 + $0x1b4] sm:$0xf]  ;;  %v407_v59 = vperm.slane %v405_v50, 0 }
  0xa3   :  { %v143_v6 = vmax.f32 %v125_v2, 0.0  ;;  %v997_v2 = vld [vmem:[#allocation5 + $0x138] sm:$0xf0] }
  0xa4   :  { %v144_v8 = vmax.f32 %v139_v4, 0.0  ;;  %707 = vmatpush.bf16.msra.mxu0 %v996_v62  ;;  %v1000_v4 = vor.u32 %v1147_v0, %v997_v2 }
  0xa5   :  { %v145_v9 = vpack.c.bf16 %v143_v6, %v141_v5  ;;  %v1061_v5 = vld [vmem:[#allocation5 + $0x1b8] sm:$0xf0]  ;;  %v1317_v6 = vld [vmem:[%s1347_s4] sm:$0x3]  ;;  %s1098_s4 = sld [smem:[#allocation7 + $0x1]] }
  0xa6   :  { %v146_v10 = vpack.c.bf16 %v144_v8, %v142_v7  ;;  %v1064_v7 = vor.u32 %v1163_v3, %v1061_v5  ;;  %v987_v8 = vld [vmem:[#allocation5 + $0x120] sm:$0xf]  ;;  %v182_v19 = vperm.slane %v1317_v6, 1  ;;  %v181_v47 = vperm.slane %v1317_v6, 0 }
  0xa7   :  { %353 = vmatmul.bf16.vlgmr.msra.gmra.mxu2 %v145_v9  ;;  %381 = vmatmul.bf16.vlgmr.msrb.gmra.mxu0 %v145_v9  ;;  %v1146_v9 = vld [vmem:[#allocation5 + $0x124] sm:$0xf0] }
  0xa8   :  { %367 = vmatmul.bf16.vlgmr.msra.gmra.mxu3 %v146_v10  ;;  %395 = vmatmul.bf16.vlgmr.msrb.gmra.mxu1 %v146_v10  ;;  %v988_v10 = vor.u32 %v1146_v9, %v987_v8 }
  0xa9   :  { %731 = vmatpush.bf16.msra.mxu2 %v1032_v22  ;;  %745 = vmatpush.bf16.msra.mxu3 %v1096_v23  ;;  %v979_v22 = vld [vmem:[#allocation5 + $0x110] sm:$0xf]  ;;  %v1144_v23 = vld [vmem:[#allocation5 + $0x114] sm:$0xf0] }
  0xaa   :  { %708 = vmatpush.bf16.msra.mxu0 %v988_v10  ;;  %v980_v25 = vor.u32 %v1144_v23, %v979_v22  ;;  %v949_v10 = vld [vmem:[%s1345_s2 + $0x2] sm:$0x3]  ;;  %s421_s2 = sld [smem:[#allocation7]] }
  0xab   :  { %v446_v16 = vperm.slane %v949_v10, 1 }
  0xad   :  { %732 = vmatpush.bf16.msra.mxu2 %v1024_v33  ;;  %746 = vmatpush.bf16.msra.mxu3 %v1088_v34  ;;  %v971_v34 = vld [vmem:[#allocation5 + $0x100] sm:$0xf] }
  0xae   :  { %709 = vmatpush.bf16.msra.mxu0 %v980_v25  ;;  %v972_v38 = vor.u32 %v1142_v35, %v971_v34 }
  0xb0   :  { %v422_v30 = vstv %s421_s2 }
  0xb1   :  { %733 = vmatpush.bf16.msra.mxu2 %v1016_v45  ;;  %747 = vmatpush.bf16.msra.mxu3 %v1080_v46  ;;  %v1157_v45 = vld [vmem:[#allocation5 + $0x184] sm:$0xf]  ;;  %v1037_v46 = vld [vmem:[#allocation5 + $0x188] sm:$0xf0] }
  0xb2   :  { %710 = vmatpush.bf16.msra.mxu0 %v972_v38  ;;  %v1040_v48 = vor.u32 %v1157_v45, %v1037_v46  ;;  %v1097_v46 = vld [vmem:[%s1348_s5 + $0x2] sm:$0x3] }
  0xb5   :  { %734 = vmatpush.bf16.msra.mxu2 %v1008_v55  ;;  %748 = vmatpush.bf16.msra.mxu3 %v1072_v58  ;;  %v408_v55 = vperm.slane %v405_v50, 1 }
  0xb7   :  { %966 = vmatmul.msk.bf16.vlgmr.msrb.gmra.mxu2 %vm109_vm0, %v1301_v15 }
  0xb8   :  { %967 = vmatmul.msk.bf16.vlgmr.msrb.gmra.mxu3 %vm109_vm0, %v1301_v15  ;;  %v1083_v15 = vld [vmem:[#allocation5 + $0x1e0] sm:$0xf] }
  0xb9   :  { %v1084_v29 = vor.u32 %v1170_v27, %v1083_v15  ;;  %735 = vmatpush.bf16.msra.mxu2 %v1000_v4  ;;  %749 = vmatpush.bf16.msra.mxu3 %v1064_v7  ;;  %v1143_v15 = vld [vmem:[#allocation5 + $0x114] sm:$0xf]  ;;  %v981_v27 = vld [vmem:[#allocation5 + $0x118] sm:$0xf0] }
  0xbb   :  { %718 = vmatpush.bf16.msra.mxu1 %v1084_v29  ;;  %v984_v29 = vor.u32 %v1143_v15, %v981_v27 }
  0xbd   :  { %736 = vmatpush.bf16.msra.mxu2 %v992_v20  ;;  %750 = vmatpush.bf16.msra.mxu3 %v1056_v21 }
  0xbf   :  { %719 = vmatpush.bf16.msra.mxu1 %v1076_v41  ;;  %v973_v41 = vld [vmem:[#allocation5 + $0x108] sm:$0xf0] }
  0xc0   :  { %v976_v44 = vor.u32 %v1141_v40, %v973_v41  ;;  %v539_v40 = vperm.slane %v968_v39, 0 }
  0xc1   :  { %737 = vmatpush.bf16.msra.mxu2 %v984_v29  ;;  %751 = vmatpush.bf16.msra.mxu3 %v1048_v32  ;;  %v427_v29 = vlaneseq }
  0xc3   :  { %720 = vmatpush.bf16.msra.mxu1 %v1068_v54  ;;  %v428_v31 = vand.u32 127, %v427_v29 }
  0xc5   :  { %738 = vmatpush.bf16.msra.mxu2 %v976_v44  ;;  %752 = vmatpush.bf16.msra.mxu3 %v1040_v48  ;;  %v540_v44 = vperm.slane %v968_v39, 1 }
  0xc7   :  { %721 = vmatpush.bf16.msra.mxu1 %v1060_v1 }
  0xcb   :  { %722 = vmatpush.bf16.msra.mxu1 %v1052_v14  ;;  %v445_v14 = vperm.slane %v949_v10, 0 }
  0xcf   :  { %723 = vmatpush.bf16.msra.mxu1 %v1044_v28 }
  0xd3   :  { %724 = vmatpush.bf16.msra.mxu1 %v1036_v43 }
 0x124   :  { %v382_v33 = vpop.f32.mrf.mxu0 }
 0x125   :  { %v383_v37 = vadd.f32 %v382_v33, %v182_v19  ;;  %v396_v42 = vpop.f32.mrf.mxu1  ;;  %v430_v33 = vadd.s32 4294967288, %v428_v31 }
 0x127   :  { %v397_v49 = vadd.f32 %v396_v42, %v383_v37 }
 0x129   :  { %v402_v56 = vmax.f32 %v397_v49, 0.0 }
 0x12a   :  { %v354_v51 = vpop.f32.mrf.mxu2 }
 0x12b   :  { %v355_v52 = vadd.f32 %v354_v51, %v181_v47  ;;  %v368_v53 = vpop.f32.mrf.mxu3  ;;  %v412_v0 = vmul.f32 %v408_v55, %v402_v56  ;;  %v766_v51 = vperm.slane %v1097_v46, 0 }
 0x12c   :  { %v384_v54 = vpop.f32.mrf.mxu0 }
 0x12d   :  { %v369_v57 = vadd.f32 %v368_v53, %v355_v52  ;;  %v385_v58 = vadd.f32 %v384_v54, %v182_v19  ;;  %v398_v61 = vpop.f32.mrf.mxu1 }
 0x12f   :  { %v401_v60 = vmax.f32 %v369_v57, 0.0  ;;  %v399_v62 = vadd.f32 %v398_v61, %v385_v58 }
 0x131   :  { %v411_v63 = vmul.f32 %v407_v59, %v401_v60  ;;  %v404_v5 = vmax.f32 %v399_v62, 0.0 }
 0x132   :  { %v356_v1 = vpop.f32.mrf.mxu2 }
 0x133   :  { %v357_v2 = vadd.f32 %v356_v1, %v181_v47  ;;  %v370_v3 = vpop.f32.mrf.mxu3  ;;  %v415_v4 = vadd.f32 %v412_v0, %v411_v63  ;;  %v414_v8 = vmul.f32 %v408_v55, %v404_v5  ;;  %v767_v55 = vperm.slane %v1097_v46, 1 }
 0x135   :  { %v371_v6 = vadd.f32 %v370_v3, %v357_v2  ;;  %416 = vadd.xlane.f32.xlu0 %v415_v4 }
 0x137   :  { %v403_v7 = vmax.f32 %v371_v6, 0.0 }
 0x139   :  { %v413_v9 = vmul.f32 %v407_v59, %v403_v7 }
 0x13a   :  { %v478_v11 = vpop.f32.mrf.mxu2 }
 0x13b   :  { %v492_v12 = vpop.f32.mrf.mxu3  ;;  %v418_v13 = vadd.f32 %v414_v8, %v413_v9  ;;  %v479_v17 = vadd.f32 %v478_v11, %v445_v14  ;;  %v781_v8 = vstv %s1098_s4 }
 0x13c   :  { %v493_v18 = vadd.f32 %v492_v12, %v446_v16 }
 0x13d   :  { %419 = vadd.xlane.f32.xlu0 %v418_v13  ;;  %v497_v23 = vmax.f32 %v479_v17, 0.0 }
 0x13e   :  { %v498_v25 = vmax.f32 %v493_v18, 0.0 }
 0x142   :  { %v480_v19 = vpop.f32.mrf.mxu2 }
 0x143   :  { %v481_v20 = vadd.f32 %v480_v19, %v445_v14  ;;  %v494_v21 = vpop.f32.mrf.mxu3 }
 0x144   :  { %v495_v22 = vadd.f32 %v494_v21, %v446_v16 }
 0x145   :  { %v499_v24 = vmax.f32 %v481_v20, 0.0 }
 0x146   :  { %v500_v26 = vmax.f32 %v495_v22, 0.0 }
 0x147   :  { %v501_v15 = vpack.c.bf16 %v499_v24, %v497_v23 }
 0x148   :  { %v502_v27 = vpack.c.bf16 %v500_v26, %v498_v25 }
 0x149   :  { %711 = vmatmul.bf16.vlgmr.msra.gmra.mxu0 %v501_v15  ;;  %739 = vmatmul.bf16.vlgmr.msra.gmra.mxu2 %v501_v15 }
 0x14a   :  { %725 = vmatmul.bf16.vlgmr.msra.gmra.mxu1 %v502_v27  ;;  %753 = vmatmul.bf16.vlgmr.msra.gmra.mxu3 %v502_v27 }
 0x1a8   :  { %v417_v28 = vpop.xlane.xlu0 %416 }
 0x1a9   :  { %v423_v32 = vadd.f32 %v422_v30, %v417_v28 }
 0x1ab   :  { %v429_v36 = vperm.slane %v423_v32, %v428_v31 }
 0x1b0   :  { %v420_v34 = vpop.xlane.xlu0 %419 }
 0x1b1   :  { %v424_v35 = vadd.f32 %v422_v30, %v420_v34 }
 0x1b3   :  { %v431_v37 = vperm.slane %v424_v35, %v430_v33 }
 0x1b5   :  { %v433_v38 = vsel %vm432_vm1, %v431_v37, %v429_v36 }
 0x1b6   :  { %436 = vst.msk [vmem:[%s1350_s7] sm:$0x1] %vm435_vm2, %v433_v38 }
 0x1c6   :  { %v712_v41 = vpop.f32.mrf.mxu0 }
 0x1c7   :  { %v713_v42 = vadd.f32 %v712_v41, %v539_v40  ;;  %v726_v43 = vpop.f32.mrf.mxu1 }
 0x1c9   :  { %v727_v45 = vadd.f32 %v726_v43, %v713_v42 }
 0x1cb   :  { %v759_v52 = vmax.f32 %v727_v45, 0.0 }
 0x1cc   :  { %v740_v47 = vpop.f32.mrf.mxu2 }
 0x1cd   :  { %v741_v48 = vadd.f32 %v740_v47, %v540_v44  ;;  %v754_v49 = vpop.f32.mrf.mxu3  ;;  %v770_v59 = vmul.f32 %v766_v51, %v759_v52 }
 0x1ce   :  { %v714_v50 = vpop.f32.mrf.mxu0 }
 0x1cf   :  { %v755_v53 = vadd.f32 %v754_v49, %v741_v48  ;;  %v715_v54 = vadd.f32 %v714_v50, %v539_v40  ;;  %v728_v57 = vpop.f32.mrf.mxu1 }
 0x1d1   :  { %v760_v56 = vmax.f32 %v755_v53, 0.0  ;;  %v729_v58 = vadd.f32 %v728_v57, %v715_v54 }
 0x1d3   :  { %v771_v60 = vmul.f32 %v767_v55, %v760_v56  ;;  %v761_v1 = vmax.f32 %v729_v58, 0.0 }
 0x1d4   :  { %v742_v61 = vpop.f32.mrf.mxu2 }
 0x1d5   :  { %v743_v62 = vadd.f32 %v742_v61, %v540_v44  ;;  %v774_v63 = vadd.f32 %v771_v60, %v770_v59  ;;  %v756_v0 = vpop.f32.mrf.mxu3  ;;  %v772_v4 = vmul.f32 %v766_v51, %v761_v1 }
 0x1d7   :  { %v757_v2 = vadd.f32 %v756_v0, %v743_v62  ;;  %775 = vadd.xlane.f32.xlu1 %v774_v63 }
 0x1d9   :  { %v762_v3 = vmax.f32 %v757_v2, 0.0 }
 0x1db   :  { %v773_v5 = vmul.f32 %v767_v55, %v762_v3 }
 0x1dd   :  { %v777_v6 = vadd.f32 %v773_v5, %v772_v4 }
 0x1df   :  { %778 = vadd.xlane.f32.xlu1 %v777_v6 }
 0x24a   :  { %v776_v7 = vpop.xlane.xlu1 %775 }
 0x24b   :  { %v782_v9 = vadd.f32 %v781_v8, %v776_v7 }
 0x24d   :  { %v786_v12 = vperm.slane %v782_v9, %v428_v31 }
 0x252   :  { %v779_v10 = vpop.xlane.xlu1 %778 }
 0x253   :  { %v783_v11 = vadd.f32 %v781_v8, %v779_v10 }
 0x255   :  { %v787_v13 = vperm.slane %v783_v11, %v430_v33 }
 0x257   :  { %v788_v14 = vsel %vm432_vm1, %v787_v13, %v786_v12 }
 0x258   :  { %1099 = vst.msk [vmem:[%s1350_s7 + $0x1] sm:$0x1] %vm435_vm2, %v788_v14 }
 0x259   :  { %796 = vsyncpa [#allocation3], 1 }
 0x25a   :  { %797 = vsyncpa [#allocation6], 1 }
 0x25b   :  { %798 = vsyncpa [#allocation4], 1 }

</bundles_post_ra>
